<compile_context>
chip_gen: v7x
topology: tpu7x:2x2x1
jax: 0.10.0
libtpu: 0.0.40
codegen_flags: <defaults>
</compile_context>

<pallas_src>
import functools

import jax
import jax.numpy as jnp
from jax.experimental import pallas as pl
from jax.experimental.pallas import tpu as pltpu


def _avg_readout_kernel(h_ref, o_ref, *, inv_n):
    # h_ref: (TB, N, F)   block of the input
    # o_ref: (TB, F)      corresponding block of the output
    h = h_ref[...].astype(jnp.float32)
    s = jnp.sum(h, axis=1) * inv_n                  # mean over node axis, f32 acc
    o_ref[...] = jax.nn.sigmoid(s).astype(o_ref.dtype)


def avg_readout(h, *, batch_block=None):
    """h: (B, N, F). Returns sigmoid(mean(h, axis=1)) with shape (B, F)."""
    B, N, F = h.shape
    if batch_block is None:
        batch_block = B if B <= 8 else 8            # whole batch when small, else 8-row tiles
    tb = batch_block
    grid = (pl.cdiv(B, tb),)

    kernel = functools.partial(_avg_readout_kernel, inv_n=1.0 / N)

    itemsize = jnp.dtype(h.dtype).itemsize
    cost = pl.CostEstimate(
        flops=B * N * F + B * F,                    # sum + scale
        transcendentals=B * F,                      # exp inside sigmoid
        bytes_accessed=B * N * F * itemsize + B * F * itemsize,
    )

    return pl.pallas_call(
        kernel,
        out_shape=jax.ShapeDtypeStruct((B, F), h.dtype),
        grid_spec=pltpu.PrefetchScalarGridSpec(
            num_scalar_prefetch=0,
            grid=grid,
            in_specs=[pl.BlockSpec((tb, N, F), lambda i: (i, 0, 0))],
            out_specs=pl.BlockSpec((tb, F), lambda i: (i, 0)),
        ),
        compiler_params=pltpu.CompilerParams(
            dimension_semantics=("parallel",)),
        cost_estimate=cost,
    )(h)


def avg_readout_ref(h):
    """Pure-JAX reference."""
    return jax.nn.sigmoid(jnp.mean(h.astype(jnp.float32), axis=1)).astype(h.dtype)


if __name__ == "__main__":
    # Small, module-consistent shapes: (batch, n_nodes, hidden).
    # F = 128 keeps the output lane-dense (the biggest measured store-path lever).
    B, N, F = 2, 16, 128

    key = jax.random.PRNGKey(0)
    h = jax.random.normal(key, (B, N, F), jnp.float32)

    out = jax.block_until_ready(avg_readout(h))
    ref = jax.block_until_ready(avg_readout_ref(h))

    assert out.shape == (B, F)
    if not jnp.allclose(out, ref, rtol=1e-5, atol=1e-5):
        raise AssertionError("Pallas kernel does not match JAX reference")

    print("KERNEL_OK")
</pallas_src>

<mosaic_0001>
module attributes {stable_mosaic.version = 11 : i64} {
  func.func @_avg_readout_kernel(%arg0: i32, %arg1: memref<2x16x128xf32, #tpu.memory_space<vmem>>, %arg2: memref<2x128xf32, #tpu.memory_space<vmem>>) attributes {dimension_semantics = [#tpu.dimension_semantics<parallel>], iteration_bounds = array<i64: 1>, scalar_prefetch = 0 : i64, scratch_operands = 0 : i64, tpu.core_type = #tpu.core_type<tc>, window_params = [{transform_indices = @transform_0, window_bounds = array<i64: 2, 16, 128>}, {transform_indices = @transform_1, window_bounds = array<i64: 2, 128>}]} {
    %c0 = arith.constant 0 : index
    %c0_0 = arith.constant 0 : index
    %c0_1 = arith.constant 0 : index
    %0 = vector.load %arg1[%c0, %c0_0, %c0_1] : memref<2x16x128xf32, #tpu.memory_space<vmem>>, vector<2x16x128xf32>
    %cst = arith.constant dense<0.000000e+00> : vector<2x128xf32>
    %1 = vector.multi_reduction <add>, %0, %cst [1] : vector<2x16x128xf32> to vector<2x128xf32>
    %cst_2 = arith.constant 6.250000e-02 : f32
    %2 = vector.broadcast %cst_2 : f32 to vector<2x128xf32>
    %3 = arith.mulf %1, %2 : vector<2x128xf32>
    %4 = arith.negf %3 : vector<2x128xf32>
    %5 = math.exp %4 : vector<2x128xf32>
    %cst_3 = arith.constant 1.000000e+00 : f32
    %6 = vector.broadcast %cst_3 : f32 to vector<2x128xf32>
    %7 = arith.addf %6, %5 : vector<2x128xf32>
    %8 = arith.divf %6, %7 : vector<2x128xf32>
    %c0_4 = arith.constant 0 : index
    %c0_5 = arith.constant 0 : index
    %9 = vector.load %arg2[%c0_4, %c0_5] : memref<2x128xf32, #tpu.memory_space<vmem>>, vector<2x128xf32>
    tpu.vector_store %arg2[%c0_4, %c0_5], %8 {strides = array<i32>} : memref<2x128xf32, #tpu.memory_space<vmem>>, vector<2x128xf32>,
    return
  }
  func.func @transform_0(%arg0: i32) -> (i32, i32, i32) {
    %c0_i32 = arith.constant 0 : i32
    %c0_i32_0 = arith.constant 0 : i32
    %c0_i32_1 = arith.constant 0 : i32
    return %arg0, %c0_i32, %c0_i32_0 : i32, i32, i32
  }
  func.func @transform_1(%arg0: i32) -> (i32, i32) {
    %c0_i32 = arith.constant 0 : i32
    %c0_i32_0 = arith.constant 0 : i32
    return %arg0, %c0_i32 : i32, i32
  }
}

</mosaic_0001>

<bundles_post_ra>
// kernel: tpu_custom_call.1
= control target key start
LH: loop header
LB: loop body
LE: loop exit
PB: predicated region body
PF: predicated region fallthrough
CT: control target
= control target key end

     0   :  { %6 = vsyncpa [#allocation3], 0  ;;  %s176_s0 = inlined_call_operand.hbm [shape: f32[2,16,128], index: 0, kind: input, shape index: {}]   ;;  %s177_s1 = inlined_call_operand.hbm [shape: f32[2,128], index: 1, kind: output, shape index: {}]  }
   0x1   :  { %7 = vsyncpa [#allocation4], 0  ;;  %s138_s6 = smov [#allocation2]   ;;  %s90_s10 = scalar_lea.hbm %s176_s0, 512 }
   0x2   :  { %s13_s7 = sshll.u32 %s138_s6, 4  ;;  %p91_p0 = scmp.ne.s32.totalorder %s176_s0, %s90_s10  ;;  %s14_s7 = int_to_ptr.vmem [resolvable:$true] %s13_s7 }
   0x3   :  { %p94_p1 = scmp.lt.u32.totalorder %s90_s10, %s176_s0 }
   0x5   :  { %p96_p2 = pnand %p94_p1, %p91_p0 }
   0x7   :  { %99 = shalt.err (!%p96_p2)
}
   0x8   :  { %s100_s15 = scalar_lea.vmem %s14_s7, 512  ;;  %p105_p4 = scmp.lt.s32.totalorder %s14_s7, %s14_s7 }
   0x9   :  { %p101_p3 = scmp.ne.s32.totalorder %s14_s7, %s100_s15  ;;  %p106_p5 = scmp.lt.s32.totalorder %s100_s15, %s100_s15 }
   0xb   :  { %p107_p6 = por %p106_p5, %p105_p4 }
   0xd   :  { %p108_p7 = pnand %p107_p6, %p101_p3 }
   0xf   :  { %111 = shalt.err (!%p108_p7)
}
  0x10   :  { %s139_s16 = smov 128   ;;  %s140_s17 = smov 8  }
  0x11   :  { %19 = dma.hbm_to_vmem [thread:$0]  %s176_s0, 512, %s14_s7, [#allocation3], %s139_s16, %s139_s16, %s140_s17  }
  0x12   :  { %134 = dma.done.wait [#allocation3], 512  }
  0x13   :  { %135 = vsyncadd [#allocation3], 4294966784  ;;  %v23_v0 = vld [vmem:[#allocation2] sm:$0xff]  ;;  %v24_v1 = vld [vmem:[#allocation2 + $0x8] sm:$0xff]  ;;  %s141_s0 = smov [#allocation5]   ;;  %vm57_vm0 = vcmask 1041409  }
  0x14   :  { %v25_v2 = vld [vmem:[#allocation2 + $0x10] sm:$0xff]  ;;  %v26_v3 = vld [vmem:[#allocation2 + $0x18] sm:$0xff]  ;;  %v27_v4 = vadd.f32 %v24_v1, %v23_v0  ;;  %s67_s20 = sshll.u32 %s141_s0, 4  ;;  %s68_s20 = int_to_ptr.vmem [resolvable:$true] %s67_s20 }
  0x15   :  { %v34_v5 = vadd.f32 %v26_v3, %v25_v2  ;;  %s112_s21 = scalar_lea.vmem %s68_s20, 32  ;;  %p117_p9 = scmp.lt.s32.totalorder %s68_s20, %s68_s20 }
  0x16   :  { %v28_v6 = vrot.slane %v27_v4, 4  ;;  %p113_p8 = scmp.ne.s32.totalorder %s68_s20, %s112_s21  ;;  %p118_p10 = scmp.lt.s32.totalorder %s112_s21, %s112_s21 }
  0x17   :  { %v35_v7 = vrot.slane %v34_v5, 4 }
  0x18   :  { %v29_v8 = vadd.f32 %v28_v6, %v27_v4  ;;  %p119_p11 = por %p118_p10, %p117_p9 }
  0x19   :  { %v36_v9 = vadd.f32 %v35_v7, %v34_v5 }
  0x1a   :  { %v30_v10 = vrot.slane %v29_v8, 2  ;;  %p120_p12 = pnand %p119_p11, %p113_p8 }
  0x1b   :  { %v37_v11 = vrot.slane %v36_v9, 2 }
  0x1c   :  { %v31_v12 = vadd.f32 %v30_v10, %v29_v8 }
  0x1d   :  { %v38_v13 = vadd.f32 %v37_v11, %v36_v9 }
  0x1e   :  { %v32_v14 = vrot.slane %v31_v12, 1 }
  0x1f   :  { %v39_v15 = vrot.slane %v38_v13, 1 }
  0x20   :  { %v33_v16 = vadd.f32 %v32_v14, %v31_v12 }
  0x21   :  { %v40_v17 = vadd.f32 %v39_v15, %v38_v13 }
  0x22   :  { %v76_v18 = vmul.f32 -0.0625, %v33_v16 }
  0x23   :  { %v77_v19 = vmul.f32 -0.0625, %v40_v17 }
  0x24   :  { %v45_v20 = vmul.f32 1.442695, %v76_v18 }
  0x25   :  { %v47_v21 = vmul.f32 1.442695, %v77_v19 }
  0x26   :  { %82 = vpow2.f32 %v45_v20 }
  0x27   :  { %84 = vpow2.f32 %v47_v21 }
  0x30   :  { %v83_v22 = vpop.eup %82 }
  0x31   :  { %v85_v23 = vpop.eup %84  ;;  %v49_v24 = vadd.f32 1.0, %v83_v22 }
  0x32   :  { %v50_v25 = vadd.f32 1.0, %v85_v23 }
  0x33   :  { %86 = vrcp.f32 %v49_v24 }
  0x34   :  { %88 = vrcp.f32 %v50_v25 }
  0x3d   :  { %v87_v26 = vpop.eup %86 }
  0x3e   :  { %v89_v27 = vpop.eup %88 }
  0x3f   :  { %v58_v28 = vsel %vm57_vm0, %v89_v27, %v87_v26 }
  0x40   :  { %60 = vst [vmem:[#allocation5] sm:$0x3] %v58_v28 }
  0x41   :  { %123 = shalt.err (!%p120_p12)
}
  0x42   :  { %s124_s24 = scalar_lea.hbm %s177_s1, 32 }
  0x43   :  { %p125_p13 = scmp.ne.s32.totalorder %s177_s1, %s124_s24  ;;  %p128_p0 = scmp.lt.u32.totalorder %s124_s24, %s177_s1 }
  0x45   :  { %p130_p1 = pnand %p128_p0, %p125_p13 }
  0x47   :  { %133 = shalt.err (!%p130_p1)
}
  0x48   :  { %70 = dma.vmem_to_hbm [thread:$0]  %s68_s20, 32, %s177_s1, [#allocation4]  }
  0x49   :  { %136 = dma.done.wait [#allocation4], 32  }
  0x4a   :  { %137 = vsyncadd [#allocation4], 4294967264 }
  0x4b   :  { %74 = vsyncpa [#allocation3], 1 }
  0x4c   :  { %75 = vsyncpa [#allocation4], 1 }

</bundles_post_ra>
